<compile_context>
chip_gen: v7x
topology: tpu7x:2x2x1
jax: 0.10.0
libtpu: 0.0.40
codegen_flags: <defaults>
</compile_context>

<pallas_src>
import jax
import jax.numpy as jnp
from jax.experimental import pallas as pl
from jax.experimental.pallas import tpu as pltpu


# ---------------------------------------------------------------------------
# Kernels
# ---------------------------------------------------------------------------

def _mean_agg_kernel_single_k(a_ref, x_ref, o_ref):
    # Whole contraction fits in one block: write the result directly, no scratch.
    o_ref[...] = jnp.dot(a_ref[...], x_ref[...],
                         preferred_element_type=jnp.float32).astype(o_ref.dtype)


def _mean_agg_kernel_acc(a_ref, x_ref, o_ref, acc_ref):
    # Grid = (row tiles, feature-column tiles, K tiles); K (contraction) last.
    k = pl.program_id(2)
    part = jnp.dot(a_ref[...], x_ref[...], preferred_element_type=jnp.float32)

    @pl.when(k == 0)
    def _():
        # Initialize with the first partial product (no zero-fill + add).
        acc_ref[...] = part

    @pl.when(k > 0)
    def _():
        acc_ref[...] += part

    @pl.when(k == pl.num_programs(2) - 1)
    def _():
        o_ref[...] = acc_ref[...].astype(o_ref.dtype)


# ---------------------------------------------------------------------------
# Tiling / wrapper
# ---------------------------------------------------------------------------

def _round_up(x, m):
    return ((x + m - 1) // m) * m


def _vmem_capacity_bytes():
    """Physical VMEM of the local TPU; conservative fallback if unavailable."""
    try:
        return int(pltpu.get_tpu_info().vmem_capacity_bytes)
    except Exception:
        return 64 * 1024 * 1024  # v7x per-TensorCore budget (smallest of the fleet)


def _resident_bytes(tm, tk, td, in_bytes, out_bytes):
    # Double-buffered input tiles + double-buffered output tile + f32 accumulator.
    return 2 * (tm * tk + tk * td) * in_bytes + tm * td * (2 * out_bytes + 4)


def _select_tiles(n, k, d, in_bytes, out_bytes, vmem_cap):
    """Pick (tm, tk, td): maximize td first (A single-pass), then tk, then tm,
    under a fraction of the device's VMEM (leaves headroom for compiler scratch)."""
    budget = max(int(vmem_cap * 0.4), 8 * 1024 * 1024)
    min_tm = 16 if in_bytes < 4 else 8  # sub-32-bit dtypes pack 2+ rows per sublane

    n_al = _round_up(n, min_tm)
    k_al = _round_up(k, 128)
    d_al = _round_up(d, 128)

    tm_cands = sorted({min(t, n_al) for t in (512, 256, 128, 64, 32, 16, 8)
                       if t >= min_tm}, reverse=True)
    tk_cands = sorted({min(t, k_al) for t in (2048, 1024, 512, 256, 128)},
                      reverse=True)
    td_cands = {min(t, d_al) for t in (2048, 1024, 512, 256, 128)}
    if d_al <= 4096:
        td_cands.add(d_al)  # prefer full-D lanes: adjacency becomes single-pass
    td_cands = sorted(td_cands, reverse=True)

    for td in td_cands:
        for tk in tk_cands:
            for tm in tm_cands:
                if _resident_bytes(tm, tk, td, in_bytes, out_bytes) <= budget:
                    return tm, tk, td
    return min_tm, 128, 128  # always fits


def mean_aggregator(A, features, *, compute_dtype=jnp.bfloat16):
    """Pallas implementation of MeanAggregator.forward: returns A @ features.

    A:        [N, K]  (caller supplies a row-normalized adjacency for "mean")
    features: [K, D]
    compute_dtype: dtype fed to the MXU (default bf16; accumulation is f32
      either way). Pass None to keep the inputs' own dtype (e.g. pure f32).
    """
    n, k_dim = A.shape
    k_dim2, d = features.shape
    assert k_dim == k_dim2, "A and features contraction dims must match"
    out_dtype = features.dtype

    if compute_dtype is not None:
        compute_dtype = jnp.dtype(compute_dtype)
        if A.dtype != compute_dtype:
            A = A.astype(compute_dtype)
        if features.dtype != compute_dtype:
            features = features.astype(compute_dtype)

    in_bytes = jnp.dtype(A.dtype).itemsize
    out_bytes = jnp.dtype(out_dtype).itemsize

    vmem_cap = _vmem_capacity_bytes()
    tm, tk, td = _select_tiles(n, k_dim, d, in_bytes, out_bytes, vmem_cap)

    # Zero-pad to tile multiples (exact for matmul: padded K rows/cols are zero,
    # padded N rows / D cols are sliced off below).
    n_pad = _round_up(n, tm)
    k_pad = _round_up(k_dim, tk)
    d_pad = _round_up(d, td)
    if (n_pad, k_pad) != (n, k_dim):
        A = jnp.pad(A, ((0, n_pad - n), (0, k_pad - k_dim)))
    if (k_pad, d_pad) != (k_dim, d):
        features = jnp.pad(features, ((0, k_pad - k_dim), (0, d_pad - d)))

    grid_i, grid_j, grid_k = n_pad // tm, d_pad // td, k_pad // tk

    resident = _resident_bytes(tm, tk, td, in_bytes, out_bytes)
    vmem_limit = int(min(int(vmem_cap * 0.9),
                         max(2 * resident, 32 * 1024 * 1024)))

    # Honest byte count: A is re-read grid_j times, features grid_i times.
    cost = pl.CostEstimate(
        flops=2 * n_pad * k_pad * d_pad,
        transcendentals=0,
        bytes_accessed=(grid_j * n_pad * k_pad + grid_i * k_pad * d_pad) * in_bytes
                        + n_pad * d_pad * out_bytes,
    )

    if grid_k == 1:
        # Whole contraction resident: 2-D grid, no scratch accumulator.
        out = pl.pallas_call(
            _mean_agg_kernel_single_k,
            out_shape=jax.ShapeDtypeStruct((n_pad, d_pad), out_dtype),
            grid_spec=pltpu.PrefetchScalarGridSpec(
                num_scalar_prefetch=0,
                grid=(grid_i, grid_j),
                in_specs=[
                    pl.BlockSpec((tm, k_pad), lambda i, j: (i, 0)),
                    pl.BlockSpec((k_pad, td), lambda i, j: (0, j)),
                ],
                out_specs=pl.BlockSpec((tm, td), lambda i, j: (i, j)),
            ),
            compiler_params=pltpu.CompilerParams(
                dimension_semantics=("parallel", "parallel"),
                vmem_limit_bytes=vmem_limit,
                allow_input_fusion=[True, True],  # fuse cast/pad into input DMA
            ),
            cost_estimate=cost,
        )(A, features)
    else:
        out = pl.pallas_call(
            _mean_agg_kernel_acc,
            out_shape=jax.ShapeDtypeStruct((n_pad, d_pad), out_dtype),
            grid_spec=pltpu.PrefetchScalarGridSpec(
                num_scalar_prefetch=0,
                grid=(grid_i, grid_j, grid_k),
                in_specs=[
                    pl.BlockSpec((tm, tk), lambda i, j, k: (i, k)),
                    pl.BlockSpec((tk, td), lambda i, j, k: (k, j)),
                ],
                out_specs=pl.BlockSpec((tm, td), lambda i, j, k: (i, j)),
                scratch_shapes=[pltpu.VMEM((tm, td), jnp.float32)],
            ),
            compiler_params=pltpu.CompilerParams(
                dimension_semantics=("parallel", "parallel", "arbitrary"),
                vmem_limit_bytes=vmem_limit,
                allow_input_fusion=[True, True],
            ),
            cost_estimate=cost,
        )(A, features)

    if (n_pad, d_pad) != (n, d):
        out = out[:n, :d]
    return out


# ---------------------------------------------------------------------------
# Demo / self-check
# ---------------------------------------------------------------------------

if __name__ == "__main__":
    key = jax.random.PRNGKey(0)
    k_x, k_a = jax.random.split(key, 2)

    # Small, but with a 128-dense feature axis and a non-trivial row extent.
    n, d = 512, 128

    features = jax.random.normal(k_x, (n, d), jnp.float32)

    # Random adjacency with self-loops, row-normalized -> mean-aggregator A.
    # (The kernel is a plain mm, exactly like the PyTorch module; the "mean"
    #  semantics live in how A is constructed.)
    adj = (jax.random.uniform(k_a, (n, n)) < 0.05).astype(jnp.float32)
    adj = adj + jnp.eye(n, dtype=jnp.float32)
    A = adj / jnp.sum(adj, axis=1, keepdims=True)

    out = mean_aggregator(A, features)  # default: bf16 MXU inputs, f32 accum
    jax.block_until_ready(out)
    assert out.shape == (n, d)
    assert out.dtype == features.dtype

    # Reference with matching precision (bf16 inputs, f32 accumulation).
    ref_bf16 = jnp.dot(A.astype(jnp.bfloat16), features.astype(jnp.bfloat16),
                       preferred_element_type=jnp.float32)
    assert jnp.allclose(out, ref_bf16, atol=5e-3, rtol=5e-3), (
        float(jnp.max(jnp.abs(out - ref_bf16))))

    # Sanity check against the exact f32 semantics of torch.mm(A, features)
    # (loose tolerance: the only difference is the bf16 input rounding).
    ref_f32 = A @ features
    assert jnp.allclose(out, ref_f32, atol=5e-2, rtol=5e-2), (
        float(jnp.max(jnp.abs(out - ref_f32))))

    print("KERNEL_OK")
</pallas_src>

<mosaic_0001>
module attributes {stable_mosaic.version = 11 : i64} {
  func.func @_mean_agg_kernel_single_k(%arg0: i32, %arg1: i32, %arg2: memref<512x512xbf16, #tpu.memory_space<vmem>>, %arg3: memref<512x128xbf16, #tpu.memory_space<vmem>>, %arg4: memref<512x128xf32, #tpu.memory_space<vmem>>) attributes {dimension_semantics = [#tpu.dimension_semantics<parallel>, #tpu.dimension_semantics<parallel>], iteration_bounds = array<i64: 1, 1>, scalar_prefetch = 0 : i64, scratch_operands = 0 : i64, tpu.core_type = #tpu.core_type<tc>, window_params = [{transform_indices = @transform_0, window_bounds = array<i64: 512, 512>}, {transform_indices = @transform_1, window_bounds = array<i64: 512, 128>}, {transform_indices = @transform_2, window_bounds = array<i64: 512, 128>}]} {
    %c0 = arith.constant 0 : index
    %c0_0 = arith.constant 0 : index
    %0 = vector.load %arg2[%c0, %c0_0] : memref<512x512xbf16, #tpu.memory_space<vmem>>, vector<512x512xbf16>
    %c0_1 = arith.constant 0 : index
    %c0_2 = arith.constant 0 : index
    %1 = vector.load %arg3[%c0_1, %c0_2] : memref<512x128xbf16, #tpu.memory_space<vmem>>, vector<512x128xbf16>
    %cst = arith.constant dense<0.000000e+00> : vector<512x128xf32>
    %2 = tpu.matmul %0, %1, %cst {dimension_numbers = #tpu.dot_dimension_numbers<[1], [0], [0], [1], [0, 0, 1, 1], [], []>} : vector<512x512xbf16>, vector<512x128xbf16>, vector<512x128xf32> -> vector<512x128xf32>
    %c0_3 = arith.constant 0 : index
    %c0_4 = arith.constant 0 : index
    %3 = vector.load %arg4[%c0_3, %c0_4] : memref<512x128xf32, #tpu.memory_space<vmem>>, vector<512x128xf32>
    tpu.vector_store %arg4[%c0_3, %c0_4], %2 {strides = array<i32>} : memref<512x128xf32, #tpu.memory_space<vmem>>, vector<512x128xf32>,
    return
  }
  func.func @transform_0(%arg0: i32, %arg1: i32) -> (i32, i32) {
    %c0_i32 = arith.constant 0 : i32
    %c0_i32_0 = arith.constant 0 : i32
    return %arg0, %c0_i32 : i32, i32
  }
  func.func @transform_1(%arg0: i32, %arg1: i32) -> (i32, i32) {
    %c0_i32 = arith.constant 0 : i32
    %c0_i32_0 = arith.constant 0 : i32
    return %c0_i32, %arg1 : i32, i32
  }
  func.func @transform_2(%arg0: i32, %arg1: i32) -> (i32, i32) {
    %c0_i32 = arith.constant 0 : i32
    return %arg0, %arg1 : i32, i32
  }
}

</mosaic_0001>

<bundles_post_ra>
// kernel: tpu_custom_call.1
= control target key start
LH: loop header
LB: loop body
LE: loop exit
PB: predicated region body
PF: predicated region fallthrough
CT: control target
= control target key end

     0   :  { %7 = vsyncpa [#allocation3], 0  ;;  %s2348_s0 = inlined_call_operand.hbm [shape: bf16[512,512], index: 0, kind: input, shape index: {}]   ;;  %s2349_s1 = inlined_call_operand.hbm [shape: bf16[512,128], index: 1, kind: input, shape index: {}]   ;;  %s2350_s2 = inlined_call_operand.hbm [shape: f32[512,128], index: 2, kind: output, shape index: {}]  }
   0x1   :  { %8 = vsyncpa [#allocation6], 0 }
   0x2   :  { %9 = vsyncpa [#allocation4], 0  ;;  %s2255_s9 = smov [#allocation2]   ;;  %s2183_s13 = scalar_lea.hbm %s2348_s0, 16384 }
   0x3   :  { %s15_s10 = sshll.u32 %s2255_s9, 4  ;;  %p2184_p0 = scmp.ne.s32.totalorder %s2348_s0, %s2183_s13  ;;  %s16_s10 = int_to_ptr.vmem [resolvable:$true] %s15_s10 }
   0x4   :  { %p2187_p1 = scmp.lt.u32.totalorder %s2183_s13, %s2348_s0 }
   0x6   :  { %p2189_p2 = pnand %p2187_p1, %p2184_p0 }
   0x8   :  { %2192 = shalt.err (!%p2189_p2)
}
   0x9   :  { %s2193_s18 = scalar_lea.vmem %s16_s10, 16384  ;;  %p2198_p4 = scmp.lt.s32.totalorder %s16_s10, %s16_s10 }
   0xa   :  { %p2194_p3 = scmp.ne.s32.totalorder %s16_s10, %s2193_s18  ;;  %p2199_p5 = scmp.lt.s32.totalorder %s2193_s18, %s2193_s18 }
   0xc   :  { %p2200_p6 = por %p2199_p5, %p2198_p4 }
   0xe   :  { %p2201_p7 = pnand %p2200_p6, %p2194_p3 }
  0x10   :  { %2204 = shalt.err (!%p2201_p7)
}
  0x11   :  { %s2256_s19 = smov 256   ;;  %s2257_s20 = smov 16  }
  0x12   :  { %21 = dma.hbm_to_vmem [thread:$0]  %s2348_s0, 16384, %s16_s10, [#allocation3], %s2256_s19, %s2256_s19, %s2257_s20  }
  0x13   :  { %s2258_s23 = smov [#allocation5]   ;;  %s2205_s27 = scalar_lea.hbm %s2349_s1, 4096 }
  0x14   :  { %s27_s24 = sshll.u32 %s2258_s23, 4  ;;  %p2206_p8 = scmp.ne.s32.totalorder %s2349_s1, %s2205_s27  ;;  %s28_s24 = int_to_ptr.vmem [resolvable:$true] %s27_s24 }
  0x15   :  { %p2209_p9 = scmp.lt.u32.totalorder %s2205_s27, %s2349_s1 }
  0x17   :  { %p2211_p10 = pnand %p2209_p9, %p2206_p8 }
  0x19   :  { %2214 = shalt.err (!%p2211_p10)
}
  0x1a   :  { %s2215_s4 = scalar_lea.vmem %s28_s24, 4096  ;;  %p2220_p12 = scmp.lt.s32.totalorder %s28_s24, %s28_s24 }
  0x1b   :  { %p2216_p11 = scmp.ne.s32.totalorder %s28_s24, %s2215_s4  ;;  %p2221_p13 = scmp.lt.s32.totalorder %s2215_s4, %s2215_s4 }
  0x1d   :  { %p2222_p0 = por %p2221_p13, %p2220_p12 }
  0x1f   :  { %p2223_p1 = pnand %p2222_p0, %p2216_p11 }
  0x21   :  { %2226 = shalt.err (!%p2223_p1)
}
  0x22   :  { %s2259_s0 = smov 64   ;;  %s2260_s5 = smov 4  }
  0x23   :  { %33 = dma.hbm_to_vmem [thread:$0]  %s2349_s1, 4096, %s28_s24, [#allocation6], %s2259_s0, %s2259_s0, %s2260_s5  }
  0x24   :  { %2249 = dma.done.wait [#allocation3], 16384  }
  0x25   :  { %2250 = vsyncadd [#allocation3], 4294950912 }
  0x26   :  { %2251 = dma.done.wait [#allocation6], 4096  }
  0x27   :  { %2252 = vsyncadd [#allocation6], 4294963200  ;;  %v2261_v0 = vmov 0   ;;  %v1959_v1 = vld [vmem:[#allocation5] sm:$0xff]   ;;  %v1961_v3 = vld [vmem:[#allocation5 + $0x8] sm:$0xff]   ;;  %s2262_s1 = smov [#allocation7]  }
  0x28   :  { %1065 = vmatprep.subr.bf16.mxu1 %v2261_v0  ;;  %1354 = vmatprep.subr.bf16.mxu0 %v2261_v0  ;;  %v1960_v2 = vld [vmem:[#allocation5 + $0x80] sm:$0xff]   ;;  %v1962_v4 = vld [vmem:[#allocation5 + $0x88] sm:$0xff]   ;;  %v1963_v5 = vld [vmem:[#allocation5 + $0x10] sm:$0xff]   ;;  %s1712_s8 = sshll.u32 %s2262_s1, 4  ;;  %s1713_s8 = int_to_ptr.vmem [resolvable:$true] %s1712_s8 }
  0x29   :  { %1066 = vmatpush1.bf16.msra.mxu1 %v1959_v1  ;;  %1355 = vmatpush1.bf16.msra.mxu0 %v1960_v2  ;;  %v1964_v6 = vld [vmem:[#allocation5 + $0x90] sm:$0xff]   ;;  %v1965_v7 = vld [vmem:[#allocation5 + $0x18] sm:$0xff]   ;;  %v1967_v9 = vld [vmem:[#allocation5 + $0x20] sm:$0xff]   ;;  %s2227_s9 = scalar_lea.vmem %s1713_s8, 8192  ;;  %p2232_p3 = scmp.lt.s32.totalorder %s1713_s8, %s1713_s8 }
  0x2a   :  { %1067 = vmatprep.subr.bf16.mxu1 %v2261_v0  ;;  %1356 = vmatprep.subr.bf16.mxu0 %v2261_v0  ;;  %v1966_v8 = vld [vmem:[#allocation5 + $0x98] sm:$0xff]   ;;  %v1968_v10 = vld [vmem:[#allocation5 + $0xa0] sm:$0xff]   ;;  %v1969_v11 = vld [vmem:[#allocation5 + $0x28] sm:$0xff]   ;;  %p2228_p2 = scmp.ne.s32.totalorder %s1713_s8, %s2227_s9  ;;  %p2233_p4 = scmp.lt.s32.totalorder %s2227_s9, %s2227_s9 }
  0x2b   :  { %v1970_v12 = vld [vmem:[#allocation5 + $0xa8] sm:$0xff]   ;;  %v1971_v13 = vld [vmem:[#allocation5 + $0x30] sm:$0xff]   ;;  %v1973_v15 = vld [vmem:[#allocation5 + $0x38] sm:$0xff]  }
  0x2c   :  { %v1972_v14 = vld [vmem:[#allocation5 + $0xb0] sm:$0xff]   ;;  %v1974_v16 = vld [vmem:[#allocation5 + $0xb8] sm:$0xff]   ;;  %v1975_v17 = vld [vmem:[#allocation5 + $0x40] sm:$0xff]   ;;  %p2234_p5 = por %p2233_p4, %p2232_p3 }
  0x2d   :  { %1068 = vmatpush1.bf16.msra.mxu1 %v1961_v3  ;;  %1357 = vmatpush1.bf16.msra.mxu0 %v1962_v4  ;;  %v1976_v18 = vld [vmem:[#allocation5 + $0xc0] sm:$0xff]   ;;  %v1977_v20 = vld [vmem:[#allocation5 + $0x48] sm:$0xff]   ;;  %v1979_v23 = vld [vmem:[#allocation5 + $0x50] sm:$0xff]  }
  0x2e   :  { %1069 = vmatprep.subr.bf16.mxu1 %v2261_v0  ;;  %1358 = vmatprep.subr.bf16.mxu0 %v2261_v0  ;;  %v1993_v19 = vld [vmem:[#allocation2 + $0x4] ss:$16 sps:$4 sm:$0xff]   ;;  %v1996_v21 = vld [vmem:[#allocation2 + $0xc] ss:$16 sps:$4 sm:$0xff]   ;;  %v1991_v35 = vld [vmem:[#allocation2] ss:$16 sps:$4 sm:$0xff]   ;;  %p2235_p6 = pnand %p2234_p5, %p2228_p2 }
  0x2f   :  { %v1978_v22 = vld [vmem:[#allocation5 + $0xc8] sm:$0xff]   ;;  %1097 = vmatprep.mubr.bf16.mxu1 %v1993_v19  ;;  %1386 = vmatprep.mubr.bf16.mxu0 %v1996_v21  ;;  %v1980_v24 = vld [vmem:[#allocation5 + $0xd0] sm:$0xff]   ;;  %v1981_v25 = vld [vmem:[#allocation5 + $0x58] sm:$0xff]  }
  0x30   :  { %v1982_v26 = vld [vmem:[#allocation5 + $0xd8] sm:$0xff]   ;;  %v1983_v27 = vld [vmem:[#allocation5 + $0x60] sm:$0xff]   ;;  %v1985_v29 = vld [vmem:[#allocation5 + $0x68] sm:$0xff]  }
  0x31   :  { %1070 = vmatpush1.bf16.msra.mxu1 %v1963_v5  ;;  %1359 = vmatpush1.bf16.msra.mxu0 %v1964_v6  ;;  %v1984_v28 = vld [vmem:[#allocation5 + $0xe0] sm:$0xff]   ;;  %v1986_v30 = vld [vmem:[#allocation5 + $0xe8] sm:$0xff]   ;;  %v1987_v31 = vld [vmem:[#allocation5 + $0x70] sm:$0xff]  }
  0x32   :  { %1071 = vmatprep.subr.bf16.mxu1 %v2261_v0  ;;  %1360 = vmatprep.subr.bf16.mxu0 %v2261_v0  ;;  %v1988_v32 = vld [vmem:[#allocation5 + $0xf0] sm:$0xff]   ;;  %v1989_v33 = vld [vmem:[#allocation5 + $0x78] sm:$0xff]  }
  0x33   :  { %v1990_v34 = vld [vmem:[#allocation5 + $0xf8] sm:$0xff]   ;;  %v1997_v37 = vld [vmem:[#allocation2 + $0x24] ss:$16 sps:$4 sm:$0xff]   ;;  %v2001_v39 = vld [vmem:[#allocation2 + $0x20] ss:$16 sps:$4 sm:$0xff]  }
  0x34   :  { %v1994_v36 = vld [vmem:[#allocation2 + $0x8] ss:$16 sps:$4 sm:$0xff]   ;;  %v1999_v38 = vld [vmem:[#allocation2 + $0x2c] ss:$16 sps:$4 sm:$0xff]   ;;  %v2003_v41 = vld [vmem:[#allocation2 + $0x44] ss:$16 sps:$4 sm:$0xff]  }
  0x35   :  { %1072 = vmatpush1.bf16.msra.mxu1 %v1965_v7  ;;  %1361 = vmatpush1.bf16.msra.mxu0 %v1966_v8  ;;  %v2002_v40 = vld [vmem:[#allocation2 + $0x28] ss:$16 sps:$4 sm:$0xff]   ;;  %v2005_v42 = vld [vmem:[#allocation2 + $0x4c] ss:$16 sps:$4 sm:$0xff]   ;;  %v2007_v43 = vld [vmem:[#allocation2 + $0x40] ss:$16 sps:$4 sm:$0xff]  }
  0x36   :  { %1073 = vmatprep.subr.bf16.mxu1 %v2261_v0  ;;  %1362 = vmatprep.subr.bf16.mxu0 %v2261_v0  ;;  %v2008_v44 = vld [vmem:[#allocation2 + $0x48] ss:$16 sps:$4 sm:$0xff]   ;;  %v2009_v45 = vld [vmem:[#allocation2 + $0x64] ss:$16 sps:$4 sm:$0xff]   ;;  %v2011_v46 = vld [vmem:[#allocation2 + $0x6c] ss:$16 sps:$4 sm:$0xff]  }
  0x37   :  { %v2013_v47 = vld [vmem:[#allocation2 + $0x60] ss:$16 sps:$4 sm:$0xff]   ;;  %v2014_v48 = vld [vmem:[#allocation2 + $0x68] ss:$16 sps:$4 sm:$0xff]   ;;  %v2015_v49 = vld [vmem:[#allocation2 + $0x84] ss:$16 sps:$4 sm:$0xff]  }
  0x38   :  { %v2017_v50 = vld [vmem:[#allocation2 + $0x8c] ss:$16 sps:$4 sm:$0xff]   ;;  %v2019_v51 = vld [vmem:[#allocation2 + $0x80] ss:$16 sps:$4 sm:$0xff]   ;;  %v2020_v52 = vld [vmem:[#allocation2 + $0x88] ss:$16 sps:$4 sm:$0xff]  }
  0x39   :  { %1074 = vmatpush1.bf16.msra.mxu1 %v1967_v9  ;;  %1363 = vmatpush1.bf16.msra.mxu0 %v1968_v10  ;;  %v2021_v53 = vld [vmem:[#allocation2 + $0xa4] ss:$16 sps:$4 sm:$0xff]   ;;  %v2023_v54 = vld [vmem:[#allocation2 + $0xac] ss:$16 sps:$4 sm:$0xff]   ;;  %v2025_v55 = vld [vmem:[#allocation2 + $0xa0] ss:$16 sps:$4 sm:$0xff]  }
  0x3a   :  { %1075 = vmatprep.subr.bf16.mxu1 %v2261_v0  ;;  %1364 = vmatprep.subr.bf16.mxu0 %v2261_v0  ;;  %v2026_v56 = vld [vmem:[#allocation2 + $0xa8] ss:$16 sps:$4 sm:$0xff]   ;;  %v2027_v57 = vld [vmem:[#allocation2 + $0xc4] ss:$16 sps:$4 sm:$0xff]   ;;  %v2029_v58 = vld [vmem:[#allocation2 + $0xcc] ss:$16 sps:$4 sm:$0xff]  }
  0x3b   :  { %v2031_v59 = vld [vmem:[#allocation2 + $0xc0] ss:$16 sps:$4 sm:$0xff]   ;;  %v2032_v60 = vld [vmem:[#allocation2 + $0xc8] ss:$16 sps:$4 sm:$0xff]   ;;  %v2033_v61 = vld [vmem:[#allocation2 + $0xe4] ss:$16 sps:$4 sm:$0xff]  }
  0x3c   :  { %v2035_v62 = vld [vmem:[#allocation2 + $0xec] ss:$16 sps:$4 sm:$0xff]   ;;  %v2037_v63 = vld [vmem:[#allocation2 + $0xe0] ss:$16 sps:$4 sm:$0xff]   ;;  %v2039_v1 = vld [vmem:[#allocation2 + $0x104] ss:$16 sps:$4 sm:$0xff]  }
  0x3d   :  { %1076 = vmatpush1.bf16.msra.mxu1 %v1969_v11  ;;  %1365 = vmatpush1.bf16.msra.mxu0 %v1970_v12  ;;  %v2041_v2 = vld [vmem:[#allocation2 + $0x10c] ss:$16 sps:$4 sm:$0xff]   ;;  %v2043_v3 = vld [vmem:[#allocation2 + $0x100] ss:$16 sps:$4 sm:$0xff]   ;;  %v2044_v4 = vld [vmem:[#allocation2 + $0x108] ss:$16 sps:$4 sm:$0xff]  }
  0x3e   :  { %1077 = vmatprep.subr.bf16.mxu1 %v2261_v0  ;;  %1366 = vmatprep.subr.bf16.mxu0 %v2261_v0  ;;  %v2045_v5 = vld [vmem:[#allocation2 + $0x124] ss:$16 sps:$4 sm:$0xff]   ;;  %v2047_v6 = vld [vmem:[#allocation2 + $0x12c] ss:$16 sps:$4 sm:$0xff]   ;;  %v2049_v7 = vld [vmem:[#allocation2 + $0x120] ss:$16 sps:$4 sm:$0xff]  }
  0x3f   :  { %v2050_v8 = vld [vmem:[#allocation2 + $0x128] ss:$16 sps:$4 sm:$0xff]   ;;  %v2051_v9 = vld [vmem:[#allocation2 + $0x144] ss:$16 sps:$4 sm:$0xff]   ;;  %v2053_v10 = vld [vmem:[#allocation2 + $0x14c] ss:$16 sps:$4 sm:$0xff]  }
  0x40   :  { %v2055_v11 = vld [vmem:[#allocation2 + $0x140] ss:$16 sps:$4 sm:$0xff]   ;;  %v2056_v12 = vld [vmem:[#allocation2 + $0x148] ss:$16 sps:$4 sm:$0xff]   ;;  %v2069_v21 = vld [vmem:[#allocation2 + $0x1a4] ss:$16 sps:$4 sm:$0xff]  }
  0x41   :  { %1078 = vmatpush1.bf16.msra.mxu1 %v1971_v13  ;;  %1367 = vmatpush1.bf16.msra.mxu0 %v1972_v14  ;;  %v2057_v13 = vld [vmem:[#allocation2 + $0x164] ss:$16 sps:$4 sm:$0xff]   ;;  %v2059_v14 = vld [vmem:[#allocation2 + $0x16c] ss:$16 sps:$4 sm:$0xff]   ;;  %v2067_v19 = vld [vmem:[#allocation2 + $0x180] ss:$16 sps:$4 sm:$0xff]  }
  0x42   :  { %1079 = vmatprep.subr.bf16.mxu1 %v2261_v0  ;;  %1368 = vmatprep.subr.bf16.mxu0 %v2261_v0 }
  0x45   :  { %1080 = vmatpush1.bf16.msra.mxu1 %v1973_v15  ;;  %1369 = vmatpush1.bf16.msra.mxu0 %v1974_v16  ;;  %v2061_v15 = vld [vmem:[#allocation2 + $0x160] ss:$16 sps:$4 sm:$0xff]   ;;  %v2062_v16 = vld [vmem:[#allocation2 + $0x168] ss:$16 sps:$4 sm:$0xff]  }
  0x46   :  { %1081 = vmatprep.subr.bf16.mxu1 %v2261_v0  ;;  %1370 = vmatprep.subr.bf16.mxu0 %v2261_v0 }
  0x49   :  { %1082 = vmatpush1.bf16.msra.mxu1 %v1975_v17  ;;  %1371 = vmatpush1.bf16.msra.mxu0 %v1976_v18  ;;  %v2063_v17 = vld [vmem:[#allocation2 + $0x184] ss:$16 sps:$4 sm:$0xff]   ;;  %v2065_v18 = vld [vmem:[#allocation2 + $0x18c] ss:$16 sps:$4 sm:$0xff]  }
  0x4a   :  { %1083 = vmatprep.subr.bf16.mxu1 %v2261_v0  ;;  %1372 = vmatprep.subr.bf16.mxu0 %v2261_v0 }
  0x4d   :  { %1084 = vmatpush1.bf16.msra.mxu1 %v1977_v20  ;;  %1373 = vmatpush1.bf16.msra.mxu0 %v1978_v22  ;;  %v2068_v20 = vld [vmem:[#allocation2 + $0x188] ss:$16 sps:$4 sm:$0xff]   ;;  %v2071_v22 = vld [vmem:[#allocation2 + $0x1ac] ss:$16 sps:$4 sm:$0xff]  }
  0x4e   :  { %1085 = vmatprep.subr.bf16.mxu1 %v2261_v0  ;;  %1374 = vmatprep.subr.bf16.mxu0 %v2261_v0 }
  0x51   :  { %1086 = vmatpush1.bf16.msra.mxu1 %v1979_v23  ;;  %1375 = vmatpush1.bf16.msra.mxu0 %v1980_v24  ;;  %v2073_v23 = vld [vmem:[#allocation2 + $0x1a0] ss:$16 sps:$4 sm:$0xff]   ;;  %v2074_v24 = vld [vmem:[#allocation2 + $0x1a8] ss:$16 sps:$4 sm:$0xff]  }
  0x52   :  { %1087 = vmatprep.subr.bf16.mxu1 %v2261_v0  ;;  %1376 = vmatprep.subr.bf16.mxu0 %v2261_v0 }
  0x55   :  { %1088 = vmatpush1.bf16.msra.mxu1 %v1981_v25  ;;  %1377 = vmatpush1.bf16.msra.mxu0 %v1982_v26  ;;  %v2075_v25 = vld [vmem:[#allocation2 + $0x1c4] ss:$16 sps:$4 sm:$0xff]   ;;  %v2077_v26 = vld [vmem:[#allocation2 + $0x1cc] ss:$16 sps:$4 sm:$0xff]  }
  0x56   :  { %1089 = vmatprep.subr.bf16.mxu1 %v2261_v0  ;;  %1378 = vmatprep.subr.bf16.mxu0 %v2261_v0 }
  0x59   :  { %1090 = vmatpush1.bf16.msra.mxu1 %v1983_v27  ;;  %1379 = vmatpush1.bf16.msra.mxu0 %v1984_v28  ;;  %v2079_v27 = vld [vmem:[#allocation2 + $0x1c0] ss:$16 sps:$4 sm:$0xff]   ;;  %v2080_v28 = vld [vmem:[#allocation2 + $0x1c8] ss:$16 sps:$4 sm:$0xff]  }
  0x5a   :  { %1091 = vmatprep.subr.bf16.mxu1 %v2261_v0  ;;  %1380 = vmatprep.subr.bf16.mxu0 %v2261_v0 }
  0x5d   :  { %1092 = vmatpush1.bf16.msra.mxu1 %v1985_v29  ;;  %1381 = vmatpush1.bf16.msra.mxu0 %v1986_v30  ;;  %v2081_v29 = vld [vmem:[#allocation2 + $0x1e4] ss:$16 sps:$4 sm:$0xff]   ;;  %v2083_v30 = vld [vmem:[#allocation2 + $0x1ec] ss:$16 sps:$4 sm:$0xff]  }
  0x5e   :  { %1093 = vmatprep.subr.bf16.mxu1 %v2261_v0  ;;  %1382 = vmatprep.subr.bf16.mxu0 %v2261_v0 }
  0x61   :  { %1094 = vmatpush1.bf16.msra.mxu1 %v1987_v31  ;;  %1383 = vmatpush1.bf16.msra.mxu0 %v1988_v32  ;;  %v2085_v31 = vld [vmem:[#allocation2 + $0x1e0] ss:$16 sps:$4 sm:$0xff]   ;;  %v2086_v32 = vld [vmem:[#allocation2 + $0x1e8] ss:$16 sps:$4 sm:$0xff]  }
  0x62   :  { %1095 = vmatprep.subr.bf16.mxu1 %v2261_v0  ;;  %1384 = vmatprep.subr.bf16.mxu0 %v2261_v0  ;;  %v2038_v0 = vld [vmem:[#allocation2 + $0xe8] ss:$16 sps:$4 sm:$0xff]  }
  0x65   :  { %1096 = vmatpush1.bf16.msra.mxu1 %v1989_v33  ;;  %1385 = vmatpush1.bf16.msra.mxu0 %v1990_v34  ;;  %v2087_v33 = vld [vmem:[#allocation2 + $0x204] ss:$16 sps:$4 sm:$0xff]   ;;  %v2089_v34 = vld [vmem:[#allocation2 + $0x20c] ss:$16 sps:$4 sm:$0xff]  }
  0x68   :  { %1098 = vmatmul.mubr.bf16.vlgmr.msra.gmra.mrb[0].mxu1 %v1991_v35  ;;  %1387 = vmatmul.mubr.bf16.vlgmr.msra.gmra.mrb[0].mxu0 %v1994_v36  ;;  %v2091_v35 = vld [vmem:[#allocation2 + $0x200] ss:$16 sps:$4 sm:$0xff]   ;;  %v2092_v36 = vld [vmem:[#allocation2 + $0x208] ss:$16 sps:$4 sm:$0xff]  }
  0x69   :  { %1105 = vmatprep.mubr.bf16.mxu1 %v1997_v37  ;;  %1394 = vmatprep.mubr.bf16.mxu0 %v1999_v38  ;;  %v2093_v37 = vld [vmem:[#allocation2 + $0x224] ss:$16 sps:$4 sm:$0xff]   ;;  %v2095_v38 = vld [vmem:[#allocation2 + $0x22c] ss:$16 sps:$4 sm:$0xff]  }
  0x70   :  { %1106 = vmatmul.mubr.bf16.gmra.mrb[4].mxu1 %v2001_v39  ;;  %1395 = vmatmul.mubr.bf16.gmra.mrb[4].mxu0 %v2002_v40  ;;  %v2097_v39 = vld [vmem:[#allocation2 + $0x220] ss:$16 sps:$4 sm:$0xff]   ;;  %v2098_v40 = vld [vmem:[#allocation2 + $0x228] ss:$16 sps:$4 sm:$0xff]  }
  0x71   :  { %1113 = vmatprep.mubr.bf16.mxu1 %v2003_v41  ;;  %1402 = vmatprep.mubr.bf16.mxu0 %v2005_v42  ;;  %v2099_v41 = vld [vmem:[#allocation2 + $0x244] ss:$16 sps:$4 sm:$0xff]   ;;  %v2101_v42 = vld [vmem:[#allocation2 + $0x24c] ss:$16 sps:$4 sm:$0xff]  }
  0x78   :  { %1114 = vmatmul.mubr.bf16.gmra.mrb[8].mxu1 %v2007_v43  ;;  %1403 = vmatmul.mubr.bf16.gmra.mrb[8].mxu0 %v2008_v44  ;;  %v2103_v43 = vld [vmem:[#allocation2 + $0x240] ss:$16 sps:$4 sm:$0xff]   ;;  %v2104_v44 = vld [vmem:[#allocation2 + $0x248] ss:$16 sps:$4 sm:$0xff]  }
  0x79   :  { %1121 = vmatprep.mubr.bf16.mxu1 %v2009_v45  ;;  %1410 = vmatprep.mubr.bf16.mxu0 %v2011_v46  ;;  %v2105_v45 = vld [vmem:[#allocation2 + $0x264] ss:$16 sps:$4 sm:$0xff]   ;;  %v2107_v46 = vld [vmem:[#allocation2 + $0x26c] ss:$16 sps:$4 sm:$0xff]  }
  0x80   :  { %1122 = vmatmul.mubr.bf16.gmra.mrb[12].mxu1 %v2013_v47  ;;  %1411 = vmatmul.mubr.bf16.gmra.mrb[12].mxu0 %v2014_v48  ;;  %v2109_v47 = vld [vmem:[#allocation2 + $0x260] ss:$16 sps:$4 sm:$0xff]   ;;  %v2110_v48 = vld [vmem:[#allocation2 + $0x268] ss:$16 sps:$4 sm:$0xff]  }
  0x81   :  { %1129 = vmatprep.mubr.bf16.mxu1 %v2015_v49  ;;  %1418 = vmatprep.mubr.bf16.mxu0 %v2017_v50  ;;  %v2111_v49 = vld [vmem:[#allocation2 + $0x284] ss:$16 sps:$4 sm:$0xff]   ;;  %v2113_v50 = vld [vmem:[#allocation2 + $0x28c] ss:$16 sps:$4 sm:$0xff]  }
  0x88   :  { %1130 = vmatmul.mubr.bf16.gmra.mrb[16].mxu1 %v2019_v51  ;;  %1419 = vmatmul.mubr.bf16.gmra.mrb[16].mxu0 %v2020_v52  ;;  %v2115_v51 = vld [vmem:[#allocation2 + $0x280] ss:$16 sps:$4 sm:$0xff]   ;;  %v2116_v52 = vld [vmem:[#allocation2 + $0x288] ss:$16 sps:$4 sm:$0xff]  }
  0x89   :  { %1137 = vmatprep.mubr.bf16.mxu1 %v2021_v53  ;;  %1426 = vmatprep.mubr.bf16.mxu0 %v2023_v54  ;;  %v2117_v53 = vld [vmem:[#allocation2 + $0x2a4] ss:$16 sps:$4 sm:$0xff]   ;;  %v2119_v54 = vld [vmem:[#allocation2 + $0x2ac] ss:$16 sps:$4 sm:$0xff]  }
  0x90   :  { %1138 = vmatmul.mubr.bf16.gmra.mrb[20].mxu1 %v2025_v55  ;;  %1427 = vmatmul.mubr.bf16.gmra.mrb[20].mxu0 %v2026_v56  ;;  %v2121_v55 = vld [vmem:[#allocation2 + $0x2a0] ss:$16 sps:$4 sm:$0xff]   ;;  %v2122_v56 = vld [vmem:[#allocation2 + $0x2a8] ss:$16 sps:$4 sm:$0xff]  }
  0x91   :  { %1145 = vmatprep.mubr.bf16.mxu1 %v2027_v57  ;;  %1434 = vmatprep.mubr.bf16.mxu0 %v2029_v58  ;;  %v2123_v57 = vld [vmem:[#allocation2 + $0x2c4] ss:$16 sps:$4 sm:$0xff]   ;;  %v2125_v58 = vld [vmem:[#allocation2 + $0x2cc] ss:$16 sps:$4 sm:$0xff]  }
  0x98   :  { %1146 = vmatmul.mubr.bf16.gmra.mrb[24].mxu1 %v2031_v59  ;;  %1435 = vmatmul.mubr.bf16.gmra.mrb[24].mxu0 %v2032_v60  ;;  %v2127_v59 = vld [vmem:[#allocation2 + $0x2c0] ss:$16 sps:$4 sm:$0xff]   ;;  %v2128_v60 = vld [vmem:[#allocation2 + $0x2c8] ss:$16 sps:$4 sm:$0xff]  }
  0x99   :  { %1153 = vmatprep.mubr.bf16.mxu1 %v2033_v61  ;;  %1442 = vmatprep.mubr.bf16.mxu0 %v2035_v62  ;;  %v2129_v61 = vld [vmem:[#allocation2 + $0x2e4] ss:$16 sps:$4 sm:$0xff]   ;;  %v2131_v62 = vld [vmem:[#allocation2 + $0x2ec] ss:$16 sps:$4 sm:$0xff]  }
  0xa0   :  { %1154 = vmatmul.mubr.bf16.gmra.mrb[28].mxu1 %v2037_v63  ;;  %1443 = vmatmul.mubr.bf16.gmra.mrb[28].mxu0 %v2038_v0  ;;  %v2133_v63 = vld [vmem:[#allocation2 + $0x2e0] ss:$16 sps:$4 sm:$0xff]   ;;  %v2134_v0 = vld [vmem:[#allocation2 + $0x2e8] ss:$16 sps:$4 sm:$0xff]  }
  0xa1   :  { %1161 = vmatprep.mubr.bf16.mxu1 %v2039_v1  ;;  %1450 = vmatprep.mubr.bf16.mxu0 %v2041_v2  ;;  %v2135_v1 = vld [vmem:[#allocation2 + $0x304] ss:$16 sps:$4 sm:$0xff]   ;;  %v2137_v2 = vld [vmem:[#allocation2 + $0x30c] ss:$16 sps:$4 sm:$0xff]  }
  0xa8   :  { %1162 = vmatmul.mubr.bf16.gmra.mrb[32].mxu1 %v2043_v3  ;;  %1451 = vmatmul.mubr.bf16.gmra.mrb[32].mxu0 %v2044_v4  ;;  %v2139_v3 = vld [vmem:[#allocation2 + $0x300] ss:$16 sps:$4 sm:$0xff]   ;;  %v2140_v4 = vld [vmem:[#allocation2 + $0x308] ss:$16 sps:$4 sm:$0xff]  }
  0xa9   :  { %1169 = vmatprep.mubr.bf16.mxu1 %v2045_v5  ;;  %1458 = vmatprep.mubr.bf16.mxu0 %v2047_v6  ;;  %v2141_v5 = vld [vmem:[#allocation2 + $0x324] ss:$16 sps:$4 sm:$0xff]   ;;  %v2143_v6 = vld [vmem:[#allocation2 + $0x32c] ss:$16 sps:$4 sm:$0xff]  }
  0xb0   :  { %1170 = vmatmul.mubr.bf16.gmra.mrb[36].mxu1 %v2049_v7  ;;  %1459 = vmatmul.mubr.bf16.gmra.mrb[36].mxu0 %v2050_v8  ;;  %v2145_v7 = vld [vmem:[#allocation2 + $0x320] ss:$16 sps:$4 sm:$0xff]   ;;  %v2146_v8 = vld [vmem:[#allocation2 + $0x328] ss:$16 sps:$4 sm:$0xff]  }
  0xb1   :  { %1177 = vmatprep.mubr.bf16.mxu1 %v2051_v9  ;;  %1466 = vmatprep.mubr.bf16.mxu0 %v2053_v10  ;;  %v2147_v9 = vld [vmem:[#allocation2 + $0x344] ss:$16 sps:$4 sm:$0xff]   ;;  %v2149_v10 = vld [vmem:[#allocation2 + $0x34c] ss:$16 sps:$4 sm:$0xff]  }
  0xb8   :  { %1178 = vmatmul.mubr.bf16.gmra.mrb[40].mxu1 %v2055_v11  ;;  %1467 = vmatmul.mubr.bf16.gmra.mrb[40].mxu0 %v2056_v12  ;;  %v2151_v11 = vld [vmem:[#allocation2 + $0x340] ss:$16 sps:$4 sm:$0xff]   ;;  %v2152_v12 = vld [vmem:[#allocation2 + $0x348] ss:$16 sps:$4 sm:$0xff]  }
  0xb9   :  { %1185 = vmatprep.mubr.bf16.mxu1 %v2057_v13  ;;  %1474 = vmatprep.mubr.bf16.mxu0 %v2059_v14  ;;  %v2153_v13 = vld [vmem:[#allocation2 + $0x364] ss:$16 sps:$4 sm:$0xff]   ;;  %v2155_v14 = vld [vmem:[#allocation2 + $0x36c] ss:$16 sps:$4 sm:$0xff]  }
  0xc0   :  { %1186 = vmatmul.mubr.bf16.gmra.mrb[44].mxu1 %v2061_v15  ;;  %1475 = vmatmul.mubr.bf16.gmra.mrb[44].mxu0 %v2062_v16 }
  0xc1   :  { %1193 = vmatprep.mubr.bf16.mxu1 %v2063_v17  ;;  %1482 = vmatprep.mubr.bf16.mxu0 %v2065_v18  ;;  %v2157_v18 = vld [vmem:[#allocation2 + $0x360] ss:$16 sps:$4 sm:$0xff]  }
  0xc8   :  { %1194 = vmatmul.mubr.bf16.gmra.mrb[48].mxu1 %v2067_v19  ;;  %1483 = vmatmul.mubr.bf16.gmra.mrb[48].mxu0 %v2068_v20 }
  0xc9   :  { %1201 = vmatprep.mubr.bf16.mxu1 %v2069_v21  ;;  %1490 = vmatprep.mubr.bf16.mxu0 %v2071_v22  ;;  %v2158_v22 = vld [vmem:[#allocation2 + $0x368] ss:$16 sps:$4 sm:$0xff]  }
  0xd0   :  { %1202 = vmatmul.mubr.bf16.gmra.mrb[52].mxu1 %v2073_v23  ;;  %1491 = vmatmul.mubr.bf16.gmra.mrb[52].mxu0 %v2074_v24  ;;  %v2159_v23 = vld [vmem:[#allocation2 + $0x384] ss:$16 sps:$4 sm:$0xff]  }
  0xd1   :  { %1209 = vmatprep.mubr.bf16.mxu1 %v2075_v25  ;;  %1498 = vmatprep.mubr.bf16.mxu0 %v2077_v26  ;;  %v2161_v26 = vld [vmem:[#allocation2 + $0x38c] ss:$16 sps:$4 sm:$0xff]  }
  0xd8   :  { %1210 = vmatmul.mubr.bf16.gmra.mrb[56].mxu1 %v2079_v27  ;;  %1499 = vmatmul.mubr.bf16.gmra.mrb[56].mxu0 %v2080_v28 }
  0xd9   :  { %1217 = vmatprep.mubr.bf16.mxu1 %v2081_v29  ;;  %1506 = vmatprep.mubr.bf16.mxu0 %v2083_v30 }
  0xe0   :  { %1218 = vmatmul.mubr.bf16.gmra.mrb[60].mxu1 %v2085_v31  ;;  %1507 = vmatmul.mubr.bf16.gmra.mrb[60].mxu0 %v2086_v32  ;;  %v2163_v32 = vld [vmem:[#allocation2 + $0x380] ss:$16 sps:$4 sm:$0xff]  }
  0xe1   :  { %1225 = vmatprep.mubr.bf16.mxu1 %v2087_v33  ;;  %1514 = vmatprep.mubr.bf16.mxu0 %v2089_v34 }
  0xe8   :  { %1226 = vmatmul.mubr.bf16.gmra.mrb[64].mxu1 %v2091_v35  ;;  %1515 = vmatmul.mubr.bf16.gmra.mrb[64].mxu0 %v2092_v36  ;;  %v2164_v36 = vld [vmem:[#allocation2 + $0x388] ss:$16 sps:$4 sm:$0xff]  }
  0xe9   :  { %1233 = vmatprep.mubr.bf16.mxu1 %v2093_v37  ;;  %1522 = vmatprep.mubr.bf16.mxu0 %v2095_v38  ;;  %v2165_v37 = vld [vmem:[#allocation2 + $0x3a4] ss:$16 sps:$4 sm:$0xff]  }
  0xf0   :  { %1234 = vmatmul.mubr.bf16.gmra.mrb[68].mxu1 %v2097_v39  ;;  %1523 = vmatmul.mubr.bf16.gmra.mrb[68].mxu0 %v2098_v40  ;;  %v2167_v40 = vld [vmem:[#allocation2 + $0x3ac] ss:$16 sps:$4 sm:$0xff]  }
  0xf1   :  { %1241 = vmatprep.mubr.bf16.mxu1 %v2099_v41  ;;  %1530 = vmatprep.mubr.bf16.mxu0 %v2101_v42 }
  0xf8   :  { %1242 = vmatmul.mubr.bf16.gmra.mrb[72].mxu1 %v2103_v43  ;;  %1531 = vmatmul.mubr.bf16.gmra.mrb[72].mxu0 %v2104_v44 }
  0xf9   :  { %1249 = vmatprep.mubr.bf16.mxu1 %v2105_v45  ;;  %1538 = vmatprep.mubr.bf16.mxu0 %v2107_v46  ;;  %v2169_v46 = vld [vmem:[#allocation2 + $0x3a0] ss:$16 sps:$4 sm:$0xff]  }
 0x100   :  { %1250 = vmatmul.mubr.bf16.gmra.mrb[76].mxu1 %v2109_v47  ;;  %1539 = vmatmul.mubr.bf16.gmra.mrb[76].mxu0 %v2110_v48 }
 0x101   :  { %1257 = vmatprep.mubr.bf16.mxu1 %v2111_v49  ;;  %1546 = vmatprep.mubr.bf16.mxu0 %v2113_v50  ;;  %v2170_v50 = vld [vmem:[#allocation2 + $0x3a8] ss:$16 sps:$4 sm:$0xff]  }
 0x108   :  { %1258 = vmatmul.mubr.bf16.gmra.mrb[80].mxu1 %v2115_v51  ;;  %1547 = vmatmul.mubr.bf16.gmra.mrb[80].mxu0 %v2116_v52  ;;  %v2171_v51 = vld [vmem:[#allocation2 + $0x3c4] ss:$16 sps:$4 sm:$0xff]  }
 0x109   :  { %1265 = vmatprep.mubr.bf16.mxu1 %v2117_v53  ;;  %1554 = vmatprep.mubr.bf16.mxu0 %v2119_v54  ;;  %v2173_v54 = vld [vmem:[#allocation2 + $0x3cc] ss:$16 sps:$4 sm:$0xff]  }
 0x110   :  { %1266 = vmatmul.mubr.bf16.gmra.mrb[84].mxu1 %v2121_v55  ;;  %1555 = vmatmul.mubr.bf16.gmra.mrb[84].mxu0 %v2122_v56 }
 0x111   :  { %1273 = vmatprep.mubr.bf16.mxu1 %v2123_v57  ;;  %1562 = vmatprep.mubr.bf16.mxu0 %v2125_v58 }
 0x118   :  { %1274 = vmatmul.mubr.bf16.gmra.mrb[88].mxu1 %v2127_v59  ;;  %1563 = vmatmul.mubr.bf16.gmra.mrb[88].mxu0 %v2128_v60  ;;  %v2175_v60 = vld [vmem:[#allocation2 + $0x3c0] ss:$16 sps:$4 sm:$0xff]  }
 0x119   :  { %1281 = vmatprep.mubr.bf16.mxu1 %v2129_v61  ;;  %1570 = vmatprep.mubr.bf16.mxu0 %v2131_v62 }
 0x120   :  { %1282 = vmatmul.mubr.bf16.gmra.mrb[92].mxu1 %v2133_v63  ;;  %1571 = vmatmul.mubr.bf16.gmra.mrb[92].mxu0 %v2134_v0  ;;  %v2176_v0 = vld [vmem:[#allocation2 + $0x3c8] ss:$16 sps:$4 sm:$0xff]  }
 0x121   :  { %1289 = vmatprep.mubr.bf16.mxu1 %v2135_v1  ;;  %1578 = vmatprep.mubr.bf16.mxu0 %v2137_v2  ;;  %v2177_v1 = vld [vmem:[#allocation2 + $0x3e4] ss:$16 sps:$4 sm:$0xff]  }
 0x128   :  { %1290 = vmatmul.mubr.bf16.gmra.mrb[96].mxu1 %v2139_v3  ;;  %1579 = vmatmul.mubr.bf16.gmra.mrb[96].mxu0 %v2140_v4  ;;  %v2179_v4 = vld [vmem:[#allocation2 + $0x3ec] ss:$16 sps:$4 sm:$0xff]  }
 0x129   :  { %1297 = vmatprep.mubr.bf16.mxu1 %v2141_v5  ;;  %1586 = vmatprep.mubr.bf16.mxu0 %v2143_v6 }
 0x130   :  { %1298 = vmatmul.mubr.bf16.gmra.mrb[100].mxu1 %v2145_v7  ;;  %1587 = vmatmul.mubr.bf16.gmra.mrb[100].mxu0 %v2146_v8 }
 0x131   :  { %1305 = vmatprep.mubr.bf16.mxu1 %v2147_v9  ;;  %1594 = vmatprep.mubr.bf16.mxu0 %v2149_v10  ;;  %v2181_v10 = vld [vmem:[#allocation2 + $0x3e0] ss:$16 sps:$4 sm:$0xff]  }
 0x138   :  { %1306 = vmatmul.mubr.bf16.gmra.mrb[104].mxu1 %v2151_v11  ;;  %1595 = vmatmul.mubr.bf16.gmra.mrb[104].mxu0 %v2152_v12 }
 0x139   :  { %1313 = vmatprep.mubr.bf16.mxu1 %v2153_v13  ;;  %1602 = vmatprep.mubr.bf16.mxu0 %v2155_v14  ;;  %v2182_v14 = vld [vmem:[#allocation2 + $0x3e8] ss:$16 sps:$4 sm:$0xff]  }
 0x13b   :  { %v1099_v15 = vpop.f32.mrb[0].mxu1  ;;  %v1388_v16 = vpop.f32.mrb[0].mxu0 }
 0x13c   :  { %v1101_v17 = vpop.f32.mrb[1].mxu1  ;;  %v1389_v19 = vadd.f32 %v1388_v16, %v1099_v15  ;;  %v1390_v20 = vpop.f32.mrb[1].mxu0 }
 0x13d   :  { %v1102_v21 = vpop.f32.mrb[2].mxu1  ;;  %v1391_v24 = vpop.f32.mrb[2].mxu0 }
 0x13e   :  { %v1104_v25 = vpop.f32.mrb[3].mxu1  ;;  %1643 = vst [vmem:[#allocation7] sm:$0xff] %v1389_v19  ;;  %v1392_v27 = vadd.f32 %v1391_v24, %v1102_v21  ;;  %v1393_v28 = vpop.f32.mrb[3].mxu0 }
 0x140   :  { %1314 = vmatmul.mubr.bf16.gmra.mrb[108].mxu1 %v2157_v18  ;;  %1644 = vst [vmem:[#allocation7 + $0x8] sm:$0xff] %v1392_v27  ;;  %1603 = vmatmul.mubr.bf16.gmra.mrb[108].mxu0 %v2158_v22 }
 0x141   :  { %1321 = vmatprep.mubr.bf16.mxu1 %v2159_v23  ;;  %1610 = vmatprep.mubr.bf16.mxu0 %v2161_v26 }
 0x143   :  { %v1107_v29 = vpop.f32.mrb[4].mxu1  ;;  %v1396_v30 = vpop.f32.mrb[4].mxu0 }
 0x144   :  { %v1109_v31 = vpop.f32.mrb[5].mxu1  ;;  %v1397_v33 = vadd.f32 %v1396_v30, %v1107_v29  ;;  %v1398_v34 = vpop.f32.mrb[5].mxu0 }
 0x145   :  { %v1110_v35 = vpop.f32.mrb[6].mxu1  ;;  %v1399_v38 = vpop.f32.mrb[6].mxu0 }
 0x146   :  { %v1112_v39 = vpop.f32.mrb[7].mxu1  ;;  %1645 = vst [vmem:[#allocation7 + $0x10] sm:$0xff] %v1397_v33  ;;  %v1400_v41 = vadd.f32 %v1399_v38, %v1110_v35  ;;  %v1401_v42 = vpop.f32.mrb[7].mxu0 }
 0x148   :  { %1322 = vmatmul.mubr.bf16.gmra.mrb[112].mxu1 %v2163_v32  ;;  %1646 = vst [vmem:[#allocation7 + $0x18] sm:$0xff] %v1400_v41  ;;  %1611 = vmatmul.mubr.bf16.gmra.mrb[112].mxu0 %v2164_v36 }
 0x149   :  { %1329 = vmatprep.mubr.bf16.mxu1 %v2165_v37  ;;  %1618 = vmatprep.mubr.bf16.mxu0 %v2167_v40 }
 0x14b   :  { %v1115_v43 = vpop.f32.mrb[8].mxu1  ;;  %v1404_v44 = vpop.f32.mrb[8].mxu0 }
 0x14c   :  { %v1117_v45 = vpop.f32.mrb[9].mxu1  ;;  %v1405_v47 = vadd.f32 %v1404_v44, %v1115_v43  ;;  %v1406_v48 = vpop.f32.mrb[9].mxu0 }
 0x14d   :  { %v1118_v49 = vpop.f32.mrb[10].mxu1  ;;  %v1407_v52 = vpop.f32.mrb[10].mxu0 }
 0x14e   :  { %v1120_v53 = vpop.f32.mrb[11].mxu1  ;;  %1647 = vst [vmem:[#allocation7 + $0x20] sm:$0xff] %v1405_v47  ;;  %v1408_v55 = vadd.f32 %v1407_v52, %v1118_v49  ;;  %v1409_v56 = vpop.f32.mrb[11].mxu0 }
 0x150   :  { %1330 = vmatmul.mubr.bf16.gmra.mrb[116].mxu1 %v2169_v46  ;;  %1648 = vst [vmem:[#allocation7 + $0x28] sm:$0xff] %v1408_v55  ;;  %1619 = vmatmul.mubr.bf16.gmra.mrb[116].mxu0 %v2170_v50 }
 0x151   :  { %1337 = vmatprep.mubr.bf16.mxu1 %v2171_v51  ;;  %1626 = vmatprep.mubr.bf16.mxu0 %v2173_v54 }
 0x153   :  { %v1123_v57 = vpop.f32.mrb[12].mxu1  ;;  %v1412_v58 = vpop.f32.mrb[12].mxu0 }
 0x154   :  { %v1125_v59 = vpop.f32.mrb[13].mxu1  ;;  %v1413_v61 = vadd.f32 %v1412_v58, %v1123_v57  ;;  %v1414_v62 = vpop.f32.mrb[13].mxu0 }
 0x155   :  { %v1126_v63 = vpop.f32.mrb[14].mxu1  ;;  %v1415_v2 = vpop.f32.mrb[14].mxu0 }
 0x156   :  { %v1128_v3 = vpop.f32.mrb[15].mxu1  ;;  %1649 = vst [vmem:[#allocation7 + $0x30] sm:$0xff] %v1413_v61  ;;  %v1416_v5 = vadd.f32 %v1415_v2, %v1126_v63  ;;  %v1417_v6 = vpop.f32.mrb[15].mxu0 }
 0x158   :  { %1338 = vmatmul.mubr.bf16.gmra.mrb[120].mxu1 %v2175_v60  ;;  %1650 = vst [vmem:[#allocation7 + $0x38] sm:$0xff] %v1416_v5  ;;  %1627 = vmatmul.mubr.bf16.gmra.mrb[120].mxu0 %v2176_v0 }
 0x159   :  { %1345 = vmatprep.mubr.bf16.mxu1 %v2177_v1  ;;  %1634 = vmatprep.mubr.bf16.mxu0 %v2179_v4 }
 0x15b   :  { %v1131_v7 = vpop.f32.mrb[16].mxu1  ;;  %v1420_v8 = vpop.f32.mrb[16].mxu0 }
 0x15c   :  { %v1133_v9 = vpop.f32.mrb[17].mxu1  ;;  %v1421_v11 = vadd.f32 %v1420_v8, %v1131_v7  ;;  %v1422_v12 = vpop.f32.mrb[17].mxu0 }
 0x15d   :  { %v1134_v13 = vpop.f32.mrb[18].mxu1  ;;  %v1423_v15 = vpop.f32.mrb[18].mxu0 }
 0x15e   :  { %v1136_v16 = vpop.f32.mrb[19].mxu1  ;;  %1651 = vst [vmem:[#allocation7 + $0x40] sm:$0xff] %v1421_v11  ;;  %v1424_v17 = vadd.f32 %v1423_v15, %v1134_v13  ;;  %v1425_v18 = vpop.f32.mrb[19].mxu0 }
 0x160   :  { %1346 = vmatmul.mubr.bf16.gmra.mrb[124].mxu1 %v2181_v10  ;;  %1652 = vst [vmem:[#allocation7 + $0x48] sm:$0xff] %v1424_v17  ;;  %1635 = vmatmul.mubr.bf16.gmra.mrb[124].mxu0 %v2182_v14 }
 0x163   :  { %v1139_v19 = vpop.f32.mrb[20].mxu1  ;;  %v1428_v20 = vpop.f32.mrb[20].mxu0 }
 0x164   :  { %v1141_v21 = vpop.f32.mrb[21].mxu1  ;;  %v1429_v22 = vadd.f32 %v1428_v20, %v1139_v19  ;;  %v1430_v23 = vpop.f32.mrb[21].mxu0 }
 0x165   :  { %v1142_v24 = vpop.f32.mrb[22].mxu1  ;;  %v1431_v25 = vpop.f32.mrb[22].mxu0 }
 0x166   :  { %v1144_v26 = vpop.f32.mrb[23].mxu1  ;;  %1653 = vst [vmem:[#allocation7 + $0x50] sm:$0xff] %v1429_v22  ;;  %v1432_v27 = vadd.f32 %v1431_v25, %v1142_v24  ;;  %v1433_v28 = vpop.f32.mrb[23].mxu0 }
 0x168   :  { %1654 = vst [vmem:[#allocation7 + $0x58] sm:$0xff] %v1432_v27 }
 0x16b   :  { %v1147_v29 = vpop.f32.mrb[24].mxu1  ;;  %v1436_v30 = vpop.f32.mrb[24].mxu0 }
 0x16c   :  { %v1149_v31 = vpop.f32.mrb[25].mxu1  ;;  %v1437_v32 = vadd.f32 %v1436_v30, %v1147_v29  ;;  %v1438_v33 = vpop.f32.mrb[25].mxu0 }
 0x16d   :  { %v1150_v34 = vpop.f32.mrb[26].mxu1  ;;  %v1439_v35 = vpop.f32.mrb[26].mxu0 }
 0x16e   :  { %v1152_v36 = vpop.f32.mrb[27].mxu1  ;;  %1655 = vst [vmem:[#allocation7 + $0x60] sm:$0xff] %v1437_v32  ;;  %v1440_v37 = vadd.f32 %v1439_v35, %v1150_v34  ;;  %v1441_v38 = vpop.f32.mrb[27].mxu0 }
 0x170   :  { %1656 = vst [vmem:[#allocation7 + $0x68] sm:$0xff] %v1440_v37 }
 0x173   :  { %v1155_v39 = vpop.f32.mrb[28].mxu1  ;;  %v1444_v40 = vpop.f32.mrb[28].mxu0 }
 0x174   :  { %v1157_v41 = vpop.f32.mrb[29].mxu1  ;;  %v1445_v42 = vadd.f32 %v1444_v40, %v1155_v39  ;;  %v1446_v43 = vpop.f32.mrb[29].mxu0 }
 0x175   :  { %v1158_v44 = vpop.f32.mrb[30].mxu1  ;;  %v1447_v45 = vpop.f32.mrb[30].mxu0 }
 0x176   :  { %v1160_v46 = vpop.f32.mrb[31].mxu1  ;;  %1657 = vst [vmem:[#allocation7 + $0x70] sm:$0xff] %v1445_v42  ;;  %v1448_v47 = vadd.f32 %v1447_v45, %v1158_v44  ;;  %v1449_v48 = vpop.f32.mrb[31].mxu0 }
 0x178   :  { %1658 = vst [vmem:[#allocation7 + $0x78] sm:$0xff] %v1448_v47 }
 0x17b   :  { %v1163_v49 = vpop.f32.mrb[32].mxu1  ;;  %v1452_v50 = vpop.f32.mrb[32].mxu0 }
 0x17c   :  { %v1165_v51 = vpop.f32.mrb[33].mxu1  ;;  %v1453_v52 = vadd.f32 %v1452_v50, %v1163_v49  ;;  %v1454_v53 = vpop.f32.mrb[33].mxu0 }
 0x17d   :  { %v1166_v54 = vpop.f32.mrb[34].mxu1  ;;  %v1455_v55 = vpop.f32.mrb[34].mxu0 }
 0x17e   :  { %v1168_v56 = vpop.f32.mrb[35].mxu1  ;;  %1659 = vst [vmem:[#allocation7 + $0x80] sm:$0xff] %v1453_v52  ;;  %v1456_v57 = vadd.f32 %v1455_v55, %v1166_v54  ;;  %v1457_v58 = vpop.f32.mrb[35].mxu0 }
 0x180   :  { %1660 = vst [vmem:[#allocation7 + $0x88] sm:$0xff] %v1456_v57 }
 0x183   :  { %v1171_v59 = vpop.f32.mrb[36].mxu1  ;;  %v1460_v60 = vpop.f32.mrb[36].mxu0 }
 0x184   :  { %v1173_v61 = vpop.f32.mrb[37].mxu1  ;;  %v1461_v62 = vadd.f32 %v1460_v60, %v1171_v59  ;;  %v1462_v63 = vpop.f32.mrb[37].mxu0 }
 0x185   :  { %v1174_v0 = vpop.f32.mrb[38].mxu1  ;;  %v1463_v1 = vpop.f32.mrb[38].mxu0 }
 0x186   :  { %v1176_v2 = vpop.f32.mrb[39].mxu1  ;;  %1661 = vst [vmem:[#allocation7 + $0x90] sm:$0xff] %v1461_v62  ;;  %v1464_v3 = vadd.f32 %v1463_v1, %v1174_v0  ;;  %v1465_v4 = vpop.f32.mrb[39].mxu0 }
 0x188   :  { %1662 = vst [vmem:[#allocation7 + $0x98] sm:$0xff] %v1464_v3 }
 0x18b   :  { %v1179_v5 = vpop.f32.mrb[40].mxu1  ;;  %v1468_v6 = vpop.f32.mrb[40].mxu0 }
 0x18c   :  { %v1181_v7 = vpop.f32.mrb[41].mxu1  ;;  %v1469_v8 = vadd.f32 %v1468_v6, %v1179_v5  ;;  %v1470_v9 = vpop.f32.mrb[41].mxu0 }
 0x18d   :  { %v1182_v10 = vpop.f32.mrb[42].mxu1  ;;  %v1471_v11 = vpop.f32.mrb[42].mxu0 }
 0x18e   :  { %v1184_v12 = vpop.f32.mrb[43].mxu1  ;;  %1663 = vst [vmem:[#allocation7 + $0xa0] sm:$0xff] %v1469_v8  ;;  %v1472_v13 = vadd.f32 %v1471_v11, %v1182_v10  ;;  %v1473_v14 = vpop.f32.mrb[43].mxu0 }
 0x190   :  { %1664 = vst [vmem:[#allocation7 + $0xa8] sm:$0xff] %v1472_v13 }
 0x193   :  { %v1187_v15 = vpop.f32.mrb[44].mxu1  ;;  %v1476_v16 = vpop.f32.mrb[44].mxu0 }
 0x194   :  { %v1189_v17 = vpop.f32.mrb[45].mxu1  ;;  %v1477_v18 = vadd.f32 %v1476_v16, %v1187_v15  ;;  %v1478_v19 = vpop.f32.mrb[45].mxu0 }
 0x195   :  { %v1190_v20 = vpop.f32.mrb[46].mxu1  ;;  %v1479_v21 = vpop.f32.mrb[46].mxu0 }
 0x196   :  { %v1192_v22 = vpop.f32.mrb[47].mxu1  ;;  %1665 = vst [vmem:[#allocation7 + $0xb0] sm:$0xff] %v1477_v18  ;;  %v1480_v23 = vadd.f32 %v1479_v21, %v1190_v20  ;;  %v1481_v24 = vpop.f32.mrb[47].mxu0 }
 0x198   :  { %1666 = vst [vmem:[#allocation7 + $0xb8] sm:$0xff] %v1480_v23 }
 0x19b   :  { %v1195_v25 = vpop.f32.mrb[48].mxu1  ;;  %v1484_v26 = vpop.f32.mrb[48].mxu0 }
 0x19c   :  { %v1197_v27 = vpop.f32.mrb[49].mxu1  ;;  %v1485_v28 = vadd.f32 %v1484_v26, %v1195_v25  ;;  %v1486_v29 = vpop.f32.mrb[49].mxu0 }
 0x19d   :  { %v1198_v30 = vpop.f32.mrb[50].mxu1  ;;  %v1487_v31 = vpop.f32.mrb[50].mxu0 }
 0x19e   :  { %v1200_v32 = vpop.f32.mrb[51].mxu1  ;;  %1667 = vst [vmem:[#allocation7 + $0xc0] sm:$0xff] %v1485_v28  ;;  %v1488_v33 = vadd.f32 %v1487_v31, %v1198_v30  ;;  %v1489_v34 = vpop.f32.mrb[51].mxu0 }
 0x1a0   :  { %1668 = vst [vmem:[#allocation7 + $0xc8] sm:$0xff] %v1488_v33 }
 0x1a3   :  { %v1203_v35 = vpop.f32.mrb[52].mxu1  ;;  %v1492_v36 = vpop.f32.mrb[52].mxu0 }
 0x1a4   :  { %v1205_v37 = vpop.f32.mrb[53].mxu1  ;;  %v1493_v38 = vadd.f32 %v1492_v36, %v1203_v35  ;;  %v1494_v39 = vpop.f32.mrb[53].mxu0 }
 0x1a5   :  { %v1206_v40 = vpop.f32.mrb[54].mxu1  ;;  %v1495_v41 = vpop.f32.mrb[54].mxu0 }
 0x1a6   :  { %v1208_v42 = vpop.f32.mrb[55].mxu1  ;;  %1669 = vst [vmem:[#allocation7 + $0xd0] sm:$0xff] %v1493_v38  ;;  %v1496_v43 = vadd.f32 %v1495_v41, %v1206_v40  ;;  %v1497_v44 = vpop.f32.mrb[55].mxu0 }
 0x1a8   :  { %1670 = vst [vmem:[#allocation7 + $0xd8] sm:$0xff] %v1496_v43 }
 0x1ab   :  { %v1211_v45 = vpop.f32.mrb[56].mxu1  ;;  %v1500_v46 = vpop.f32.mrb[56].mxu0 }
 0x1ac   :  { %v1213_v47 = vpop.f32.mrb[57].mxu1  ;;  %v1501_v48 = vadd.f32 %v1500_v46, %v1211_v45  ;;  %v1502_v49 = vpop.f32.mrb[57].mxu0 }
 0x1ad   :  { %v1214_v50 = vpop.f32.mrb[58].mxu1  ;;  %v1503_v51 = vpop.f32.mrb[58].mxu0 }
 0x1ae   :  { %v1216_v52 = vpop.f32.mrb[59].mxu1  ;;  %1671 = vst [vmem:[#allocation7 + $0xe0] sm:$0xff] %v1501_v48  ;;  %v1504_v53 = vadd.f32 %v1503_v51, %v1214_v50  ;;  %v1505_v54 = vpop.f32.mrb[59].mxu0 }
 0x1b0   :  { %1672 = vst [vmem:[#allocation7 + $0xe8] sm:$0xff] %v1504_v53 }
 0x1b3   :  { %v1219_v55 = vpop.f32.mrb[60].mxu1  ;;  %v1508_v56 = vpop.f32.mrb[60].mxu0 }
 0x1b4   :  { %v1221_v57 = vpop.f32.mrb[61].mxu1  ;;  %v1509_v58 = vadd.f32 %v1508_v56, %v1219_v55  ;;  %v1510_v59 = vpop.f32.mrb[61].mxu0 }
 0x1b5   :  { %v1222_v60 = vpop.f32.mrb[62].mxu1  ;;  %v1511_v61 = vpop.f32.mrb[62].mxu0 }
 0x1b6   :  { %v1224_v62 = vpop.f32.mrb[63].mxu1  ;;  %1673 = vst [vmem:[#allocation7 + $0xf0] sm:$0xff] %v1509_v58  ;;  %v1512_v63 = vadd.f32 %v1511_v61, %v1222_v60  ;;  %v1513_v0 = vpop.f32.mrb[63].mxu0 }
 0x1b8   :  { %1674 = vst [vmem:[#allocation7 + $0xf8] sm:$0xff] %v1512_v63 }
 0x1bb   :  { %v1227_v1 = vpop.f32.mrb[64].mxu1  ;;  %v1516_v2 = vpop.f32.mrb[64].mxu0 }
 0x1bc   :  { %v1229_v3 = vpop.f32.mrb[65].mxu1  ;;  %v1517_v4 = vadd.f32 %v1516_v2, %v1227_v1  ;;  %v1518_v5 = vpop.f32.mrb[65].mxu0 }
 0x1bd   :  { %v1230_v6 = vpop.f32.mrb[66].mxu1  ;;  %v1519_v7 = vpop.f32.mrb[66].mxu0 }
 0x1be   :  { %v1232_v8 = vpop.f32.mrb[67].mxu1  ;;  %1675 = vst [vmem:[#allocation7 + $0x100] sm:$0xff] %v1517_v4  ;;  %v1520_v9 = vadd.f32 %v1519_v7, %v1230_v6  ;;  %v1521_v10 = vpop.f32.mrb[67].mxu0 }
 0x1c0   :  { %1676 = vst [vmem:[#allocation7 + $0x108] sm:$0xff] %v1520_v9 }
 0x1c3   :  { %v1235_v11 = vpop.f32.mrb[68].mxu1  ;;  %v1524_v12 = vpop.f32.mrb[68].mxu0 }
 0x1c4   :  { %v1237_v13 = vpop.f32.mrb[69].mxu1  ;;  %v1525_v14 = vadd.f32 %v1524_v12, %v1235_v11  ;;  %v1526_v15 = vpop.f32.mrb[69].mxu0 }
 0x1c5   :  { %v1238_v16 = vpop.f32.mrb[70].mxu1  ;;  %v1527_v17 = vpop.f32.mrb[70].mxu0 }
 0x1c6   :  { %v1240_v18 = vpop.f32.mrb[71].mxu1  ;;  %1677 = vst [vmem:[#allocation7 + $0x110] sm:$0xff] %v1525_v14  ;;  %v1528_v19 = vadd.f32 %v1527_v17, %v1238_v16  ;;  %v1529_v20 = vpop.f32.mrb[71].mxu0 }
 0x1c8   :  { %1678 = vst [vmem:[#allocation7 + $0x118] sm:$0xff] %v1528_v19 }
 0x1cb   :  { %v1243_v21 = vpop.f32.mrb[72].mxu1  ;;  %v1532_v22 = vpop.f32.mrb[72].mxu0 }
 0x1cc   :  { %v1245_v23 = vpop.f32.mrb[73].mxu1  ;;  %v1533_v24 = vadd.f32 %v1532_v22, %v1243_v21  ;;  %v1534_v25 = vpop.f32.mrb[73].mxu0 }
 0x1cd   :  { %v1246_v26 = vpop.f32.mrb[74].mxu1  ;;  %v1535_v27 = vpop.f32.mrb[74].mxu0 }
 0x1ce   :  { %v1248_v28 = vpop.f32.mrb[75].mxu1  ;;  %1679 = vst [vmem:[#allocation7 + $0x120] sm:$0xff] %v1533_v24  ;;  %v1536_v29 = vadd.f32 %v1535_v27, %v1246_v26  ;;  %v1537_v30 = vpop.f32.mrb[75].mxu0 }
 0x1d0   :  { %1680 = vst [vmem:[#allocation7 + $0x128] sm:$0xff] %v1536_v29 }
 0x1d3   :  { %v1251_v31 = vpop.f32.mrb[76].mxu1  ;;  %v1540_v32 = vpop.f32.mrb[76].mxu0 }
 0x1d4   :  { %v1253_v33 = vpop.f32.mrb[77].mxu1  ;;  %v1541_v34 = vadd.f32 %v1540_v32, %v1251_v31  ;;  %v1542_v35 = vpop.f32.mrb[77].mxu0 }
 0x1d5   :  { %v1254_v36 = vpop.f32.mrb[78].mxu1  ;;  %v1543_v37 = vpop.f32.mrb[78].mxu0 }
 0x1d6   :  { %v1256_v38 = vpop.f32.mrb[79].mxu1  ;;  %1681 = vst [vmem:[#allocation7 + $0x130] sm:$0xff] %v1541_v34  ;;  %v1544_v39 = vadd.f32 %v1543_v37, %v1254_v36  ;;  %v1545_v40 = vpop.f32.mrb[79].mxu0 }
 0x1d8   :  { %1682 = vst [vmem:[#allocation7 + $0x138] sm:$0xff] %v1544_v39 }
 0x1db   :  { %v1259_v41 = vpop.f32.mrb[80].mxu1  ;;  %v1548_v42 = vpop.f32.mrb[80].mxu0 }
 0x1dc   :  { %v1261_v43 = vpop.f32.mrb[81].mxu1  ;;  %v1549_v44 = vadd.f32 %v1548_v42, %v1259_v41  ;;  %v1550_v45 = vpop.f32.mrb[81].mxu0 }
 0x1dd   :  { %v1262_v46 = vpop.f32.mrb[82].mxu1  ;;  %v1551_v47 = vpop.f32.mrb[82].mxu0 }
 0x1de   :  { %v1264_v48 = vpop.f32.mrb[83].mxu1  ;;  %1683 = vst [vmem:[#allocation7 + $0x140] sm:$0xff] %v1549_v44  ;;  %v1552_v49 = vadd.f32 %v1551_v47, %v1262_v46  ;;  %v1553_v50 = vpop.f32.mrb[83].mxu0 }
 0x1e0   :  { %1684 = vst [vmem:[#allocation7 + $0x148] sm:$0xff] %v1552_v49 }
 0x1e3   :  { %v1267_v51 = vpop.f32.mrb[84].mxu1  ;;  %v1556_v52 = vpop.f32.mrb[84].mxu0 }
 0x1e4   :  { %v1269_v53 = vpop.f32.mrb[85].mxu1  ;;  %v1557_v54 = vadd.f32 %v1556_v52, %v1267_v51  ;;  %v1558_v55 = vpop.f32.mrb[85].mxu0 }
 0x1e5   :  { %v1270_v56 = vpop.f32.mrb[86].mxu1  ;;  %v1559_v57 = vpop.f32.mrb[86].mxu0 }
 0x1e6   :  { %v1272_v58 = vpop.f32.mrb[87].mxu1  ;;  %1685 = vst [vmem:[#allocation7 + $0x150] sm:$0xff] %v1557_v54  ;;  %v1560_v59 = vadd.f32 %v1559_v57, %v1270_v56  ;;  %v1561_v60 = vpop.f32.mrb[87].mxu0 }
 0x1e8   :  { %1686 = vst [vmem:[#allocation7 + $0x158] sm:$0xff] %v1560_v59 }
 0x1eb   :  { %v1275_v61 = vpop.f32.mrb[88].mxu1  ;;  %v1564_v62 = vpop.f32.mrb[88].mxu0 }
 0x1ec   :  { %v1277_v63 = vpop.f32.mrb[89].mxu1  ;;  %v1565_v0 = vadd.f32 %v1564_v62, %v1275_v61  ;;  %v1566_v1 = vpop.f32.mrb[89].mxu0 }
 0x1ed   :  { %v1278_v2 = vpop.f32.mrb[90].mxu1  ;;  %v1567_v3 = vpop.f32.mrb[90].mxu0 }
 0x1ee   :  { %v1280_v4 = vpop.f32.mrb[91].mxu1  ;;  %1687 = vst [vmem:[#allocation7 + $0x160] sm:$0xff] %v1565_v0  ;;  %v1568_v5 = vadd.f32 %v1567_v3, %v1278_v2  ;;  %v1569_v6 = vpop.f32.mrb[91].mxu0 }
 0x1f0   :  { %1688 = vst [vmem:[#allocation7 + $0x168] sm:$0xff] %v1568_v5 }
 0x1f3   :  { %v1283_v7 = vpop.f32.mrb[92].mxu1  ;;  %v1572_v8 = vpop.f32.mrb[92].mxu0 }
 0x1f4   :  { %v1285_v9 = vpop.f32.mrb[93].mxu1  ;;  %v1573_v10 = vadd.f32 %v1572_v8, %v1283_v7  ;;  %v1574_v11 = vpop.f32.mrb[93].mxu0 }
 0x1f5   :  { %v1286_v12 = vpop.f32.mrb[94].mxu1  ;;  %v1575_v13 = vpop.f32.mrb[94].mxu0 }
 0x1f6   :  { %v1288_v14 = vpop.f32.mrb[95].mxu1  ;;  %1689 = vst [vmem:[#allocation7 + $0x170] sm:$0xff] %v1573_v10  ;;  %v1576_v15 = vadd.f32 %v1575_v13, %v1286_v12  ;;  %v1577_v16 = vpop.f32.mrb[95].mxu0 }
 0x1f8   :  { %1690 = vst [vmem:[#allocation7 + $0x178] sm:$0xff] %v1576_v15 }
 0x1fb   :  { %v1291_v17 = vpop.f32.mrb[96].mxu1  ;;  %v1580_v18 = vpop.f32.mrb[96].mxu0 }
 0x1fc   :  { %v1293_v19 = vpop.f32.mrb[97].mxu1  ;;  %v1581_v20 = vadd.f32 %v1580_v18, %v1291_v17  ;;  %v1582_v21 = vpop.f32.mrb[97].mxu0 }
 0x1fd   :  { %v1294_v22 = vpop.f32.mrb[98].mxu1  ;;  %v1583_v23 = vpop.f32.mrb[98].mxu0 }
 0x1fe   :  { %v1296_v24 = vpop.f32.mrb[99].mxu1  ;;  %1691 = vst [vmem:[#allocation7 + $0x180] sm:$0xff] %v1581_v20  ;;  %v1584_v25 = vadd.f32 %v1583_v23, %v1294_v22  ;;  %v1585_v26 = vpop.f32.mrb[99].mxu0 }
 0x200   :  { %1692 = vst [vmem:[#allocation7 + $0x188] sm:$0xff] %v1584_v25 }
 0x203   :  { %v1299_v27 = vpop.f32.mrb[100].mxu1  ;;  %v1588_v28 = vpop.f32.mrb[100].mxu0 }
 0x204   :  { %v1301_v29 = vpop.f32.mrb[101].mxu1  ;;  %v1589_v30 = vadd.f32 %v1588_v28, %v1299_v27  ;;  %v1590_v31 = vpop.f32.mrb[101].mxu0 }
 0x205   :  { %v1302_v32 = vpop.f32.mrb[102].mxu1  ;;  %v1591_v33 = vpop.f32.mrb[102].mxu0 }
 0x206   :  { %v1304_v34 = vpop.f32.mrb[103].mxu1  ;;  %1693 = vst [vmem:[#allocation7 + $0x190] sm:$0xff] %v1589_v30  ;;  %v1592_v35 = vadd.f32 %v1591_v33, %v1302_v32  ;;  %v1593_v36 = vpop.f32.mrb[103].mxu0 }
 0x208   :  { %1694 = vst [vmem:[#allocation7 + $0x198] sm:$0xff] %v1592_v35 }
 0x20b   :  { %v1307_v37 = vpop.f32.mrb[104].mxu1  ;;  %v1596_v38 = vpop.f32.mrb[104].mxu0 }
 0x20c   :  { %v1309_v39 = vpop.f32.mrb[105].mxu1  ;;  %v1597_v40 = vadd.f32 %v1596_v38, %v1307_v37  ;;  %v1598_v41 = vpop.f32.mrb[105].mxu0 }
 0x20d   :  { %v1310_v42 = vpop.f32.mrb[106].mxu1  ;;  %v1599_v43 = vpop.f32.mrb[106].mxu0 }
 0x20e   :  { %v1312_v44 = vpop.f32.mrb[107].mxu1  ;;  %1695 = vst [vmem:[#allocation7 + $0x1a0] sm:$0xff] %v1597_v40  ;;  %v1600_v45 = vadd.f32 %v1599_v43, %v1310_v42  ;;  %v1601_v46 = vpop.f32.mrb[107].mxu0 }
 0x210   :  { %1696 = vst [vmem:[#allocation7 + $0x1a8] sm:$0xff] %v1600_v45 }
 0x213   :  { %v1315_v47 = vpop.f32.mrb[108].mxu1  ;;  %v1604_v48 = vpop.f32.mrb[108].mxu0 }
 0x214   :  { %v1317_v49 = vpop.f32.mrb[109].mxu1  ;;  %v1605_v50 = vadd.f32 %v1604_v48, %v1315_v47  ;;  %v1606_v51 = vpop.f32.mrb[109].mxu0 }
 0x215   :  { %v1318_v52 = vpop.f32.mrb[110].mxu1  ;;  %v1607_v53 = vpop.f32.mrb[110].mxu0 }
 0x216   :  { %v1320_v54 = vpop.f32.mrb[111].mxu1  ;;  %1697 = vst [vmem:[#allocation7 + $0x1b0] sm:$0xff] %v1605_v50  ;;  %v1608_v55 = vadd.f32 %v1607_v53, %v1318_v52  ;;  %v1609_v56 = vpop.f32.mrb[111].mxu0 }
 0x218   :  { %1698 = vst [vmem:[#allocation7 + $0x1b8] sm:$0xff] %v1608_v55 }
 0x21b   :  { %v1323_v57 = vpop.f32.mrb[112].mxu1  ;;  %v1612_v58 = vpop.f32.mrb[112].mxu0 }
 0x21c   :  { %v1325_v59 = vpop.f32.mrb[113].mxu1  ;;  %v1613_v60 = vadd.f32 %v1612_v58, %v1323_v57  ;;  %v1614_v61 = vpop.f32.mrb[113].mxu0 }
 0x21d   :  { %v1326_v62 = vpop.f32.mrb[114].mxu1  ;;  %v1615_v63 = vpop.f32.mrb[114].mxu0 }
 0x21e   :  { %v1328_v0 = vpop.f32.mrb[115].mxu1  ;;  %1699 = vst [vmem:[#allocation7 + $0x1c0] sm:$0xff] %v1613_v60  ;;  %v1616_v1 = vadd.f32 %v1615_v63, %v1326_v62  ;;  %v1617_v2 = vpop.f32.mrb[115].mxu0 }
 0x220   :  { %1700 = vst [vmem:[#allocation7 + $0x1c8] sm:$0xff] %v1616_v1 }
 0x223   :  { %v1331_v3 = vpop.f32.mrb[116].mxu1  ;;  %v1620_v4 = vpop.f32.mrb[116].mxu0 }
 0x224   :  { %v1333_v5 = vpop.f32.mrb[117].mxu1  ;;  %v1621_v6 = vadd.f32 %v1620_v4, %v1331_v3  ;;  %v1622_v7 = vpop.f32.mrb[117].mxu0 }
 0x225   :  { %v1334_v8 = vpop.f32.mrb[118].mxu1  ;;  %v1623_v9 = vpop.f32.mrb[118].mxu0 }
 0x226   :  { %v1336_v10 = vpop.f32.mrb[119].mxu1  ;;  %1701 = vst [vmem:[#allocation7 + $0x1d0] sm:$0xff] %v1621_v6  ;;  %v1624_v11 = vadd.f32 %v1623_v9, %v1334_v8  ;;  %v1625_v12 = vpop.f32.mrb[119].mxu0 }
 0x228   :  { %1702 = vst [vmem:[#allocation7 + $0x1d8] sm:$0xff] %v1624_v11 }
 0x22b   :  { %v1339_v13 = vpop.f32.mrb[120].mxu1  ;;  %v1628_v14 = vpop.f32.mrb[120].mxu0 }
 0x22c   :  { %v1341_v15 = vpop.f32.mrb[121].mxu1  ;;  %v1629_v16 = vadd.f32 %v1628_v14, %v1339_v13  ;;  %v1630_v17 = vpop.f32.mrb[121].mxu0 }
 0x22d   :  { %v1342_v18 = vpop.f32.mrb[122].mxu1  ;;  %v1631_v19 = vpop.f32.mrb[122].mxu0 }
 0x22e   :  { %v1344_v20 = vpop.f32.mrb[123].mxu1  ;;  %1703 = vst [vmem:[#allocation7 + $0x1e0] sm:$0xff] %v1629_v16  ;;  %v1632_v21 = vadd.f32 %v1631_v19, %v1342_v18  ;;  %v1633_v22 = vpop.f32.mrb[123].mxu0 }
 0x230   :  { %1704 = vst [vmem:[#allocation7 + $0x1e8] sm:$0xff] %v1632_v21 }
 0x233   :  { %v1347_v23 = vpop.f32.mrb[124].mxu1  ;;  %v1636_v24 = vpop.f32.mrb[124].mxu0 }
 0x234   :  { %v1349_v25 = vpop.f32.mrb[125].mxu1  ;;  %v1637_v26 = vadd.f32 %v1636_v24, %v1347_v23  ;;  %v1638_v27 = vpop.f32.mrb[125].mxu0 }
 0x235   :  { %v1350_v28 = vpop.f32.mrb[126].mxu1  ;;  %v1639_v29 = vpop.f32.mrb[126].mxu0 }
 0x236   :  { %v1352_v30 = vpop.f32.mrb[127].mxu1  ;;  %1705 = vst [vmem:[#allocation7 + $0x1f0] sm:$0xff] %v1637_v26  ;;  %v1640_v31 = vadd.f32 %v1639_v29, %v1350_v28  ;;  %v1641_v32 = vpop.f32.mrb[127].mxu0 }
 0x238   :  { %1706 = vst [vmem:[#allocation7 + $0x1f8] sm:$0xff] %v1640_v31 }
 0x239   :  { %2238 = shalt.err (!%p2235_p6)
}
 0x23a   :  { %s2239_s12 = scalar_lea.hbm %s2350_s2, 8192 }
 0x23b   :  { %p2240_p7 = scmp.ne.s32.totalorder %s2350_s2, %s2239_s12  ;;  %p2243_p8 = scmp.lt.u32.totalorder %s2239_s12, %s2350_s2 }
 0x23d   :  { %p2245_p9 = pnand %p2243_p8, %p2240_p7 }
 0x23f   :  { %2248 = shalt.err (!%p2245_p9)
}
 0x240   :  { %s2263_s17 = smov 128   ;;  %s2264_s18 = smov 8  }
 0x241   :  { %1718 = dma.vmem_to_hbm [thread:$0]  %s1713_s8, 8192, %s2350_s2, [#allocation4], %s2263_s17, %s2263_s17, %s2264_s18  }
 0x242   :  { %2253 = dma.done.wait [#allocation4], 8192  }
 0x243   :  { %2254 = vsyncadd [#allocation4], 4294959104 }
 0x244   :  { %1722 = vsyncpa [#allocation3], 1 }
 0x245   :  { %1723 = vsyncpa [#allocation6], 1 }
 0x246   :  { %1724 = vsyncpa [#allocation4], 1 }

</bundles_post_ra>
